<compile_context>
chip_gen: v5e
topology: v5e:2x2
jax: 0.10.0
libtpu: 0.0.40
codegen_flags: <defaults>
</compile_context>

<pallas_src>
import jax
import jax.numpy as jnp
from jax import lax
from jax.experimental import pallas as pl
from jax.experimental.pallas import tpu as pltpu

HIDDEN = 256
NUM_CLASSES = 5
NPAD = 128           # lane-dense padded logit width (multiple of 128)
TM_CAP = 1024        # large-M row-tile cap (v7x VMEM-safe)


def _round_up(x, m):
    return -(-x // m) * m


def _fused_head_kernel(ids_ref, emb_ref, w1t_ref, b1_ref, w2t_ref, b2_ref,
                       o_ref):
    """ids:(TM,1) i32, emb:(V,H) bf16, w1t:(H,H) bf16, b1:(1,H) f32,
    w2t:(H,NPAD) bf16, b2:(1,NPAD) f32 -> o:(TM,NPAD) f32."""
    tm = ids_ref.shape[0]
    vocab = emb_ref.shape[0]

    # Fused embedding gather: exact one-hot row selection on the MXU, all bf16
    # inputs (one-hot entries 0/1 are exact in bf16) with f32 accumulation.
    ids = ids_ref[...]                                          # (TM, 1)
    iota = lax.broadcasted_iota(jnp.int32, (tm, vocab), 1)      # (TM, V)
    one_hot = (ids == iota).astype(jnp.bfloat16)                # (TM, V) bf16
    x = jnp.dot(one_hot, emb_ref[...],
                preferred_element_type=jnp.float32)             # (TM, H) f32

    # dense -> dropout(p=0.0) -> relu
    h = jnp.dot(x.astype(jnp.bfloat16), w1t_ref[...],
                preferred_element_type=jnp.float32) + b1_ref[...]
    h = jnp.maximum(h, 0.0)

    # out_proj (lane-padded to NPAD) -> relu
    y = jnp.dot(h.astype(jnp.bfloat16), w2t_ref[...],
                preferred_element_type=jnp.float32) + b2_ref[...]
    o_ref[...] = jnp.maximum(y, 0.0)


def fused_head(ids, emb_bf16, w1t, b1r, w2t_pad, b2r_pad, *, tm):
    """ids: (M, 1) int32 with M % tm == 0. Returns (M, NPAD) float32."""
    M = ids.shape[0]
    vocab = emb_bf16.shape[0]
    assert M % tm == 0 and tm % 8 == 0
    return pl.pallas_call(
        _fused_head_kernel,
        out_shape=jax.ShapeDtypeStruct((M, NPAD), jnp.float32),
        grid=(M // tm,),
        in_specs=[
            pl.BlockSpec((tm, 1), lambda i: (i, 0)),           # token ids
            pl.BlockSpec((vocab, HIDDEN), lambda i: (0, 0)),   # emb bf16 (resident)
            pl.BlockSpec((HIDDEN, HIDDEN), lambda i: (0, 0)),  # W1^T (resident)
            pl.BlockSpec((1, HIDDEN), lambda i: (0, 0)),       # b1
            pl.BlockSpec((HIDDEN, NPAD), lambda i: (0, 0)),    # W2^T padded
            pl.BlockSpec((1, NPAD), lambda i: (0, 0)),         # b2 padded
        ],
        out_specs=pl.BlockSpec((tm, NPAD), lambda i: (i, 0)),  # lane-dense
        compiler_params=pltpu.CompilerParams(
            dimension_semantics=("parallel",),
            vmem_limit_bytes=32 * 1024 * 1024),
    )(ids, emb_bf16, w1t, b1r, w2t_pad, b2r_pad)


def init_params(key, vocab_size=512):
    k_emb, k_w1, k_b1, k_w2, k_b2 = jax.random.split(key, 5)
    # Substitute "base model": deterministic embedding table -> (B, S, 256).
    emb = jax.random.normal(k_emb, (vocab_size, HIDDEN), jnp.float32) * 0.02
    # ClassificationHead params (shapes of nn.Linear(256,256) / (256,5)).
    bound = 1.0 / (HIDDEN ** 0.5)
    w1 = jax.random.uniform(k_w1, (HIDDEN, HIDDEN), jnp.float32, -bound, bound)
    b1 = jax.random.uniform(k_b1, (HIDDEN,), jnp.float32, -bound, bound)
    w2 = jax.random.uniform(k_w2, (NUM_CLASSES, HIDDEN), jnp.float32, -bound, bound)
    b2 = jax.random.uniform(k_b2, (NUM_CLASSES,), jnp.float32, -bound, bound)
    return emb, w1, b1, w2, b2


def prepare_params(emb, w1, b1, w2, b2):
    """One-time prep: cast emb to bf16, transpose/pad/cast head weights."""
    emb_bf16 = emb.astype(jnp.bfloat16)                           # (V, H)
    w1t = w1.T.astype(jnp.bfloat16)                               # (H, H)
    b1r = b1.reshape(1, HIDDEN).astype(jnp.float32)               # (1, H)
    w2t_pad = jnp.zeros((HIDDEN, NPAD), jnp.float32)
    w2t_pad = w2t_pad.at[:, :NUM_CLASSES].set(w2.T).astype(jnp.bfloat16)
    b2r_pad = jnp.zeros((1, NPAD), jnp.float32).at[0, :NUM_CLASSES].set(b2)
    return emb_bf16, w1t, b1r, w2t_pad, b2r_pad


def _pick_tile(M):
    """Row-tile / padded-M selection (static, based on input shape)."""
    if M <= 256:
        tm = _round_up(M, 8)            # one tile, grid=(1,)
        m_pad = tm
    elif M <= 2 * TM_CAP:
        tm = _round_up(pl.cdiv(M, 2), 8)  # exactly 2 parallel tiles -> both
        m_pad = 2 * tm                    # v7x TensorCores busy
    else:
        tm = TM_CAP                      # large M: big tiles amortize ~0.35us
        m_pad = _round_up(M, TM_CAP)     # per-step overhead; v7x VMEM-safe
    return tm, m_pad


def codet5_classification_forward(input_ids, attention_mask, prepared):
    # attention_mask is accepted but unused, matching the PyTorch forward
    # (base_model is called with input_ids only).
    del attention_mask
    emb_bf16, w1t, b1r, w2t_pad, b2r_pad = prepared
    B, S = input_ids.shape
    M = B * S
    tm, m_pad = _pick_tile(M)
    ids = input_ids.reshape(M, 1).astype(jnp.int32)
    if m_pad != M:
        ids = jnp.pad(ids, ((0, m_pad - M), (0, 0)))
    y_pad = fused_head(ids, emb_bf16, w1t, b1r, w2t_pad, b2r_pad, tm=tm)
    return y_pad[:M, :NUM_CLASSES].reshape(B, S, NUM_CLASSES)


if __name__ == "__main__":
    key = jax.random.PRNGKey(0)
    k_params, k_ids = jax.random.split(key)
    raw = init_params(k_params, vocab_size=512)
    prepared = prepare_params(*raw)

    B, S = 2, 8
    input_ids = jax.random.randint(k_ids, (B, S), 0, 512, dtype=jnp.int32)
    attention_mask = jnp.ones((B, S), dtype=jnp.int32)

    forward = jax.jit(codet5_classification_forward)
    out = forward(input_ids, attention_mask, prepared)
    jax.block_until_ready(out)

    # Reference in plain JAX (same math, same bf16 matmul inputs, no Pallas).
    emb, w1, b1, w2, b2 = raw
    hid = emb[input_ids].reshape(B * S, HIDDEN)
    h = jnp.dot(hid.astype(jnp.bfloat16), w1.T.astype(jnp.bfloat16),
                preferred_element_type=jnp.float32) + b1
    h = jnp.maximum(h, 0.0)
    y = jnp.dot(h.astype(jnp.bfloat16), w2.T.astype(jnp.bfloat16),
                preferred_element_type=jnp.float32) + b2
    ref = jnp.maximum(y, 0.0).reshape(B, S, NUM_CLASSES)

    assert out.shape == (B, S, NUM_CLASSES)
    assert jnp.allclose(out, ref, atol=1e-4, rtol=1e-3), (
        "max abs err %.3e" % float(jnp.max(jnp.abs(out - ref))))

    print("KERNEL_OK")
</pallas_src>

<mosaic_0001>
module attributes {stable_mosaic.version = 11 : i64} {
  func.func @_fused_head_kernel(%arg0: i32, %arg1: memref<16x1xi32, #tpu.memory_space<vmem>>, %arg2: memref<512x256xbf16, #tpu.memory_space<vmem>>, %arg3: memref<256x256xbf16, #tpu.memory_space<vmem>>, %arg4: memref<1x256xf32, #tpu.memory_space<vmem>>, %arg5: memref<256x128xbf16, #tpu.memory_space<vmem>>, %arg6: memref<1x128xf32, #tpu.memory_space<vmem>>, %arg7: memref<16x128xf32, #tpu.memory_space<vmem>>) attributes {dimension_semantics = [#tpu.dimension_semantics<parallel>], iteration_bounds = array<i64: 1>, scalar_prefetch = 0 : i64, scratch_operands = 0 : i64, tpu.core_type = #tpu.core_type<tc>, window_params = [{transform_indices = @transform_0, window_bounds = array<i64: 16, 1>}, {pipeline_mode = #tpu.pipeline_mode<synchronous>, transform_indices = @transform_1, window_bounds = array<i64: 512, 256>}, {pipeline_mode = #tpu.pipeline_mode<synchronous>, transform_indices = @transform_2, window_bounds = array<i64: 256, 256>}, {pipeline_mode = #tpu.pipeline_mode<synchronous>, transform_indices = @transform_3, window_bounds = array<i64: 1, 256>}, {pipeline_mode = #tpu.pipeline_mode<synchronous>, transform_indices = @transform_4, window_bounds = array<i64: 256, 128>}, {pipeline_mode = #tpu.pipeline_mode<synchronous>, transform_indices = @transform_5, window_bounds = array<i64: 1, 128>}, {transform_indices = @transform_6, window_bounds = array<i64: 16, 128>}]} {
    %c0 = arith.constant 0 : index
    %c0_0 = arith.constant 0 : index
    %0 = vector.load %arg1[%c0, %c0_0] : memref<16x1xi32, #tpu.memory_space<vmem>>, vector<16x1xi32>
    %1 = tpu.iota {dimensions = array<i32: 1>} : vector<16x512xi32>
    %2 = vector.broadcast %0 : vector<16x1xi32> to vector<16x512xi32>
    %3 = arith.cmpi eq, %2, %1 : vector<16x512xi32>
    %4 = arith.extui %3 : vector<16x512xi1> to vector<16x512xi32>
    %5 = arith.sitofp %4 : vector<16x512xi32> to vector<16x512xf32>
    %6 = arith.truncf %5 : vector<16x512xf32> to vector<16x512xbf16>
    %c0_1 = arith.constant 0 : index
    %c0_2 = arith.constant 0 : index
    %7 = vector.load %arg2[%c0_1, %c0_2] : memref<512x256xbf16, #tpu.memory_space<vmem>>, vector<512x256xbf16>
    %cst = arith.constant dense<0.000000e+00> : vector<16x256xf32>
    %8 = tpu.matmul %6, %7, %cst {dimension_numbers = #tpu.dot_dimension_numbers<[1], [0], [0], [1], [0, 0, 1, 1], [], []>} : vector<16x512xbf16>, vector<512x256xbf16>, vector<16x256xf32> -> vector<16x256xf32>
    %9 = arith.truncf %8 : vector<16x256xf32> to vector<16x256xbf16>
    %c0_3 = arith.constant 0 : index
    %c0_4 = arith.constant 0 : index
    %10 = vector.load %arg3[%c0_3, %c0_4] : memref<256x256xbf16, #tpu.memory_space<vmem>>, vector<256x256xbf16>
    %cst_5 = arith.constant dense<0.000000e+00> : vector<16x256xf32>
    %11 = tpu.matmul %9, %10, %cst_5 {dimension_numbers = #tpu.dot_dimension_numbers<[1], [0], [0], [1], [0, 0, 1, 1], [], []>} : vector<16x256xbf16>, vector<256x256xbf16>, vector<16x256xf32> -> vector<16x256xf32>
    %c0_6 = arith.constant 0 : index
    %c0_7 = arith.constant 0 : index
    %12 = vector.load %arg4[%c0_6, %c0_7] : memref<1x256xf32, #tpu.memory_space<vmem>>, vector<1x256xf32>
    %13 = vector.broadcast %12 : vector<1x256xf32> to vector<16x256xf32>
    %14 = arith.addf %11, %13 : vector<16x256xf32>
    %cst_8 = arith.constant 0.000000e+00 : f32
    %15 = vector.broadcast %cst_8 : f32 to vector<16x256xf32>
    %16 = arith.maximumf %14, %15 : vector<16x256xf32>
    %17 = arith.truncf %16 : vector<16x256xf32> to vector<16x256xbf16>
    %c0_9 = arith.constant 0 : index
    %c0_10 = arith.constant 0 : index
    %18 = vector.load %arg5[%c0_9, %c0_10] : memref<256x128xbf16, #tpu.memory_space<vmem>>, vector<256x128xbf16>
    %cst_11 = arith.constant dense<0.000000e+00> : vector<16x128xf32>
    %19 = tpu.matmul %17, %18, %cst_11 {dimension_numbers = #tpu.dot_dimension_numbers<[1], [0], [0], [1], [0, 0, 1, 1], [], []>} : vector<16x256xbf16>, vector<256x128xbf16>, vector<16x128xf32> -> vector<16x128xf32>
    %c0_12 = arith.constant 0 : index
    %c0_13 = arith.constant 0 : index
    %20 = vector.load %arg6[%c0_12, %c0_13] : memref<1x128xf32, #tpu.memory_space<vmem>>, vector<1x128xf32>
    %21 = vector.broadcast %20 : vector<1x128xf32> to vector<16x128xf32>
    %22 = arith.addf %19, %21 : vector<16x128xf32>
    %cst_14 = arith.constant 0.000000e+00 : f32
    %23 = vector.broadcast %cst_14 : f32 to vector<16x128xf32>
    %24 = arith.maximumf %22, %23 : vector<16x128xf32>
    %c0_15 = arith.constant 0 : index
    %c0_16 = arith.constant 0 : index
    %25 = vector.load %arg7[%c0_15, %c0_16] : memref<16x128xf32, #tpu.memory_space<vmem>>, vector<16x128xf32>
    tpu.vector_store %arg7[%c0_15, %c0_16], %24 {strides = array<i32>} : memref<16x128xf32, #tpu.memory_space<vmem>>, vector<16x128xf32>,
    return
  }
  func.func @transform_0(%arg0: i32) -> (i32, i32) {
    %c0_i32 = arith.constant 0 : i32
    %c0_i32_0 = arith.constant 0 : i32
    return %arg0, %c0_i32 : i32, i32
  }
  func.func @transform_1(%arg0: i32) -> (i32, i32) {
    %c0_i32 = arith.constant 0 : i32
    %c0_i32_0 = arith.constant 0 : i32
    %c0_i32_1 = arith.constant 0 : i32
    return %c0_i32, %c0_i32_0 : i32, i32
  }
  func.func @transform_2(%arg0: i32) -> (i32, i32) {
    %c0_i32 = arith.constant 0 : i32
    %c0_i32_0 = arith.constant 0 : i32
    %c0_i32_1 = arith.constant 0 : i32
    return %c0_i32, %c0_i32_0 : i32, i32
  }
  func.func @transform_3(%arg0: i32) -> (i32, i32) {
    %c0_i32 = arith.constant 0 : i32
    %c0_i32_0 = arith.constant 0 : i32
    %c0_i32_1 = arith.constant 0 : i32
    return %c0_i32, %c0_i32_0 : i32, i32
  }
  func.func @transform_4(%arg0: i32) -> (i32, i32) {
    %c0_i32 = arith.constant 0 : i32
    %c0_i32_0 = arith.constant 0 : i32
    %c0_i32_1 = arith.constant 0 : i32
    return %c0_i32, %c0_i32_0 : i32, i32
  }
  func.func @transform_5(%arg0: i32) -> (i32, i32) {
    %c0_i32 = arith.constant 0 : i32
    %c0_i32_0 = arith.constant 0 : i32
    %c0_i32_1 = arith.constant 0 : i32
    return %c0_i32, %c0_i32_0 : i32, i32
  }
  func.func @transform_6(%arg0: i32) -> (i32, i32) {
    %c0_i32 = arith.constant 0 : i32
    %c0_i32_0 = arith.constant 0 : i32
    return %arg0, %c0_i32 : i32, i32
  }
}

</mosaic_0001>

<bundles_post_ra>
// kernel: codet5_classification_forward.1
= control target key start
LH: loop header
LB: loop body
LE: loop exit
PB: predicated region body
PF: predicated region fallthrough
CT: control target
= control target key end

     0   :  { %11 = vsyncpa [#allocation3], 0  ;;  %s1813_s0 = inlined_call_operand.vmem [shape: s32[16,1], index: 0, kind: input, shape index: {}]   ;;  %s1814_s1 = inlined_call_operand.hbm [shape: bf16[512,256], index: 1, kind: input, shape index: {}]   ;;  %s1815_s2 = inlined_call_operand.hbm [shape: bf16[256,256], index: 2, kind: input, shape index: {}]   ;;  %s1816_s3 = inlined_call_operand.vmem [shape: f32[1,256], index: 3, kind: input, shape index: {}]   ;;  %s1817_s4 = inlined_call_operand.hbm [shape: bf16[256,128], index: 4, kind: input, shape index: {}]   ;;  %s1818_s5 = inlined_call_operand.vmem [shape: f32[1,128], index: 5, kind: input, shape index: {}]   ;;  %s1819_s6 = inlined_call_operand.vmem [shape: f32[16,128], index: 6, kind: output, shape index: {}]  }
   0x1   :  { %12 = vsyncpa [#allocation5], 0  ;;  %s32_s23 = sshll.u32 %s1815_s2, 4  ;;  %s1710_s24 = smov [#allocation4]   ;;  %s33_s23 = int_to_ptr.hbm [resolvable:$true] %s32_s23 }
   0x2   :  { %s34_s25 = sshll.u32 %s1710_s24, 4  ;;  %s19_s28 = sshll.u32 %s1814_s1, 4  ;;  %s35_s25 = int_to_ptr.vmem [resolvable:$true] %s34_s25  ;;  %s20_s28 = int_to_ptr.hbm [resolvable:$true] %s19_s28 }
   0x3   :  { %s1711_s29 = smov 128   ;;  %s1712_s30 = smov 8  }
   0x4   :  { %40 = dma.hbm_to_vmem [thread:$0]  %s33_s23, 4096, %s35_s25, [#allocation5], %s1711_s29, %s1711_s29, %s1712_s30  }
   0x5   :  { %s1713_s7 = smov [#allocation2]   ;;  %s47_s11 = sshll.u32 %s1817_s4, 4  ;;  %s48_s11 = int_to_ptr.hbm [resolvable:$true] %s47_s11 }
   0x6   :  { %s21_s8 = sshll.u32 %s1713_s7, 4  ;;  %s1714_s2 = smov [#allocation6]   ;;  %s22_s8 = int_to_ptr.vmem [resolvable:$true] %s21_s8 }
   0x7   :  { %27 = dma.hbm_to_vmem [thread:$0]  %s20_s28, 8192, %s22_s8, [#allocation3], %s1711_s29, %s1711_s29, %s1712_s30  }
   0x8   :  { %s49_s12 = sshll.u32 %s1714_s2, 4  ;;  %s1715_s13 = smov 64   ;;  %s50_s12 = int_to_ptr.vmem [resolvable:$true] %s49_s12 }
   0x9   :  { %s1716_s14 = smov 4  }
   0xa   :  { %55 = dma.hbm_to_vmem [thread:$0]  %s48_s11, 2048, %s50_s12, [#allocation5], %s1715_s13, %s1715_s13, %s1716_s14  }
   0xb   :  { %1706 = dma.done.wait [#allocation3], 8192  }
   0xc   :  { %1707 = vsyncadd [#allocation3], 4294959104 }
   0xd   :  { %1708 = dma.done.wait [#allocation5], 6144  }
   0xe   :  { %1709 = vsyncadd [#allocation5], 4294961152  ;;  %v1717_v0 = vmov 0   ;;  %v70_v1 = vld [vmem:[%s1813_s0] sm:$0xff]  ;;  %v1105_v2 = vld [vmem:[#allocation2 + $0x70] sm:$0xf] }
   0xf   :  { %1632 = vset.pattern.permute.xlu0 %v1717_v0  ;;  %v1526_v3 = vld [vmem:[#allocation2 + $0x74] sm:$0xf0]  ;;  %v1169_v4 = vld [vmem:[#allocation2 + $0xf0] sm:$0xf]  ;;  %v1097_v13 = vld [vmem:[#allocation2 + $0x60] sm:$0xf] }
  0x10   :  { %78 = vperm.xlu0 %1632, %v70_v1   ;;  %v1542_v5 = vld [vmem:[#allocation2 + $0xf4] sm:$0xf0]  ;;  %v1106_v6 = vor.u32 %v1526_v3, %v1105_v2  ;;  %v1233_v8 = vld [vmem:[#allocation2 + $0x170] sm:$0xf]  ;;  %v1524_v14 = vld [vmem:[#allocation2 + $0x64] sm:$0xf0] }
  0x11   :  { %v1170_v7 = vor.u32 %v1542_v5, %v1169_v4  ;;  %v1558_v9 = vld [vmem:[#allocation2 + $0x174] sm:$0xf0]  ;;  %v1297_v10 = vld [vmem:[#allocation2 + $0x1f0] sm:$0xf]  ;;  %v71_v15 = vld [vmem:[%s1813_s0 + $0x8] sm:$0xff]  ;;  %v1098_v17 = vor.u32 %v1524_v14, %v1097_v13 }
  0x12   :  { %v1234_v11 = vor.u32 %v1558_v9, %v1233_v8  ;;  %v1574_v12 = vld [vmem:[#allocation2 + $0x1f4] sm:$0xf0]  ;;  %495 = vmatpush.bf16.msra.mxu0 %v1106_v6  ;;  %v1161_v18 = vld [vmem:[#allocation2 + $0xe0] sm:$0xf]  ;;  %v1540_v19 = vld [vmem:[#allocation2 + $0xe4] sm:$0xf0] }
  0x13   :  { %509 = vmatpush.bf16.msra.mxu1 %v1170_v7  ;;  %v1298_v16 = vor.u32 %v1574_v12, %v1297_v10  ;;  %v1225_v20 = vld [vmem:[#allocation2 + $0x160] sm:$0xf]  ;;  %v1162_v21 = vor.u32 %v1540_v19, %v1161_v18  ;;  %v1556_v22 = vld [vmem:[#allocation2 + $0x164] sm:$0xf0]  ;;  %v1089_v27 = vld [vmem:[#allocation2 + $0x50] sm:$0xf] }
  0x14   :  { %523 = vmatpush.bf16.msra.mxu2 %v1234_v11  ;;  %v1289_v23 = vld [vmem:[#allocation2 + $0x1e0] sm:$0xf]  ;;  %v1572_v24 = vld [vmem:[#allocation2 + $0x1e4] sm:$0xf0]  ;;  %v1226_v25 = vor.u32 %v1556_v22, %v1225_v20  ;;  %v1522_v28 = vld [vmem:[#allocation2 + $0x54] sm:$0xf0] }
  0x15   :  { %537 = vmatpush.bf16.msra.mxu3 %v1298_v16  ;;  %v1290_v26 = vor.u32 %v1572_v24, %v1289_v23  ;;  %v1153_v29 = vld [vmem:[#allocation2 + $0xd0] sm:$0xf]  ;;  %v1538_v30 = vld [vmem:[#allocation2 + $0xd4] sm:$0xf0]  ;;  %v1090_v33 = vor.u32 %v1522_v28, %v1089_v27  ;;  %v1081_v37 = vld [vmem:[#allocation2 + $0x40] sm:$0xf] }
  0x16   :  { %v1217_v31 = vld [vmem:[#allocation2 + $0x150] sm:$0xf]  ;;  %v1554_v32 = vld [vmem:[#allocation2 + $0x154] sm:$0xf0]  ;;  %496 = vmatpush.bf16.msra.mxu0 %v1098_v17  ;;  %v1154_v34 = vor.u32 %v1538_v30, %v1153_v29  ;;  %v1520_v39 = vld [vmem:[#allocation2 + $0x44] sm:$0xf0] }
  0x17   :  { %510 = vmatpush.bf16.msra.mxu1 %v1162_v21  ;;  %v1281_v35 = vld [vmem:[#allocation2 + $0x1d0] sm:$0xf]  ;;  %v1570_v36 = vld [vmem:[#allocation2 + $0x1d4] sm:$0xf0]  ;;  %v1218_v38 = vor.u32 %v1554_v32, %v1217_v31  ;;  %v1145_v40 = vld [vmem:[#allocation2 + $0xc0] sm:$0xf]  ;;  %v1082_v47 = vor.u32 %v1520_v39, %v1081_v37 }
  0x18   :  { %81 = vperm.xlu0 %1632, %v71_v15   ;;  %524 = vmatpush.bf16.msra.mxu2 %v1226_v25  ;;  %v1536_v41 = vld [vmem:[#allocation2 + $0xc4] sm:$0xf0]  ;;  %v1282_v42 = vor.u32 %v1570_v36, %v1281_v35  ;;  %v1209_v43 = vld [vmem:[#allocation2 + $0x140] sm:$0xf]  ;;  %v1073_v49 = vld [vmem:[#allocation2 + $0x30] sm:$0xf] }
  0x19   :  { %538 = vmatpush.bf16.msra.mxu3 %v1290_v26  ;;  %v1552_v44 = vld [vmem:[#allocation2 + $0x144] sm:$0xf0]  ;;  %v1273_v45 = vld [vmem:[#allocation2 + $0x1c0] sm:$0xf]  ;;  %v1146_v48 = vor.u32 %v1536_v41, %v1145_v40  ;;  %v1518_v51 = vld [vmem:[#allocation2 + $0x34] sm:$0xf0] }
  0x1a   :  { %v1568_v46 = vld [vmem:[#allocation2 + $0x1c4] sm:$0xf0]  ;;  %497 = vmatpush.bf16.msra.mxu0 %v1090_v33  ;;  %v1210_v50 = vor.u32 %v1552_v44, %v1209_v43  ;;  %v1137_v52 = vld [vmem:[#allocation2 + $0xb0] sm:$0xf]  ;;  %v1534_v53 = vld [vmem:[#allocation2 + $0xb4] sm:$0xf0]  ;;  %v1074_v59 = vor.u32 %v1518_v51, %v1073_v49 }
  0x1b   :  { %511 = vmatpush.bf16.msra.mxu1 %v1154_v34  ;;  %v1274_v54 = vor.u32 %v1568_v46, %v1273_v45  ;;  %v1201_v55 = vld [vmem:[#allocation2 + $0x130] sm:$0xf]  ;;  %v1550_v56 = vld [vmem:[#allocation2 + $0x134] sm:$0xf0]  ;;  %v1138_v60 = vor.u32 %v1534_v53, %v1137_v52  ;;  %v1065_v61 = vld [vmem:[#allocation2 + $0x20] sm:$0xf] }
  0x1c   :  { %525 = vmatpush.bf16.msra.mxu2 %v1218_v38  ;;  %v1265_v57 = vld [vmem:[#allocation2 + $0x1b0] sm:$0xf]  ;;  %v1566_v58 = vld [vmem:[#allocation2 + $0x1b4] sm:$0xf0]  ;;  %v1202_v62 = vor.u32 %v1550_v56, %v1201_v55  ;;  %v1516_v63 = vld [vmem:[#allocation2 + $0x24] sm:$0xf0] }
  0x1d   :  { %539 = vmatpush.bf16.msra.mxu3 %v1282_v42  ;;  %v1129_v0 = vld [vmem:[#allocation2 + $0xa0] sm:$0xf]  ;;  %v1532_v1 = vld [vmem:[#allocation2 + $0xa4] sm:$0xf0]  ;;  %v1266_v2 = vor.u32 %v1566_v58, %v1265_v57  ;;  %v1066_v7 = vor.u32 %v1516_v63, %v1065_v61  ;;  %v1057_v9 = vld [vmem:[#allocation2 + $0x10] sm:$0xf] }
  0x1e   :  { %498 = vmatpush.bf16.msra.mxu0 %v1082_v47  ;;  %v1193_v3 = vld [vmem:[#allocation2 + $0x120] sm:$0xf]  ;;  %v1548_v4 = vld [vmem:[#allocation2 + $0x124] sm:$0xf0]  ;;  %v1130_v8 = vor.u32 %v1532_v1, %v1129_v0  ;;  %v1514_v11 = vld [vmem:[#allocation2 + $0x14] sm:$0xf0] }
  0x1f   :  { %512 = vmatpush.bf16.msra.mxu1 %v1146_v48  ;;  %v1257_v5 = vld [vmem:[#allocation2 + $0x1a0] sm:$0xf]  ;;  %v1564_v6 = vld [vmem:[#allocation2 + $0x1a4] sm:$0xf0]  ;;  %v1194_v10 = vor.u32 %v1548_v4, %v1193_v3  ;;  %v1121_v12 = vld [vmem:[#allocation2 + $0x90] sm:$0xf]  ;;  %v1058_v21 = vor.u32 %v1514_v11, %v1057_v9 }
  0x20   :  { %526 = vmatpush.bf16.msra.mxu2 %v1210_v50  ;;  %v1530_v13 = vld [vmem:[#allocation2 + $0x94] sm:$0xf0]  ;;  %v1258_v14 = vor.u32 %v1564_v6, %v1257_v5  ;;  %v1185_v15 = vld [vmem:[#allocation2 + $0x110] sm:$0xf]  ;;  %v1049_v19 = vld [vmem:[#allocation2] sm:$0xf] }
  0x21   :  { %540 = vmatpush.bf16.msra.mxu3 %v1274_v54  ;;  %v1546_v16 = vld [vmem:[#allocation2 + $0x114] sm:$0xf0]  ;;  %v1249_v17 = vld [vmem:[#allocation2 + $0x190] sm:$0xf]  ;;  %v1512_v20 = vld [vmem:[#allocation2 + $0x4] sm:$0xf0]  ;;  %v1122_v22 = vor.u32 %v1530_v13, %v1121_v12 }
  0x22   :  { %499 = vmatpush.bf16.msra.mxu0 %v1074_v59  ;;  %v1562_v18 = vld [vmem:[#allocation2 + $0x194] sm:$0xf0]  ;;  %v1113_v23 = vld [vmem:[#allocation2 + $0x80] sm:$0xf]  ;;  %v1528_v24 = vld [vmem:[#allocation2 + $0x84] sm:$0xf0]  ;;  %v1186_v26 = vor.u32 %v1546_v16, %v1185_v15  ;;  %v1050_v36 = vor.u32 %v1512_v20, %v1049_v19 }
  0x23   :  { %513 = vmatpush.bf16.msra.mxu1 %v1138_v60  ;;  %v1177_v25 = vld [vmem:[#allocation2 + $0x100] sm:$0xf]  ;;  %v1544_v27 = vld [vmem:[#allocation2 + $0x104] sm:$0xf0]  ;;  %v1250_v30 = vor.u32 %v1562_v18, %v1249_v17  ;;  %v1525_v31 = vld [vmem:[#allocation2 + $0x74] sm:$0xf]  ;;  %v1114_v37 = vor.u32 %v1528_v24, %v1113_v23 }
  0x24   :  { %527 = vmatpush.bf16.msra.mxu2 %v1202_v62  ;;  %v1241_v28 = vld [vmem:[#allocation2 + $0x180] sm:$0xf]  ;;  %v1560_v29 = vld [vmem:[#allocation2 + $0x184] sm:$0xf0]  ;;  %v1107_v32 = vld [vmem:[#allocation2 + $0x78] sm:$0xf0]  ;;  %v1178_v41 = vor.u32 %v1544_v27, %v1177_v25 }
  0x25   :  { %541 = vmatpush.bf16.msra.mxu3 %v1266_v2  ;;  %v1541_v33 = vld [vmem:[#allocation2 + $0xf4] sm:$0xf]  ;;  %v1171_v34 = vld [vmem:[#allocation2 + $0xf8] sm:$0xf0]  ;;  %v1110_v42 = vor.u32 %v1525_v31, %v1107_v32  ;;  %v1242_v43 = vor.u32 %v1560_v29, %v1241_v28  ;;  %v1523_v45 = vld [vmem:[#allocation2 + $0x64] sm:$0xf] }
  0x26   :  { %500 = vmatpush.bf16.msra.mxu0 %v1066_v7  ;;  %v1557_v35 = vld [vmem:[#allocation2 + $0x174] sm:$0xf]  ;;  %v1235_v38 = vld [vmem:[#allocation2 + $0x178] sm:$0xf0]  ;;  %v1174_v44 = vor.u32 %v1541_v33, %v1171_v34  ;;  %v1099_v46 = vld [vmem:[#allocation2 + $0x68] sm:$0xf0] }
  0x27   :  { %514 = vmatpush.bf16.msra.mxu1 %v1130_v8  ;;  %v1573_v39 = vld [vmem:[#allocation2 + $0x1f4] sm:$0xf]  ;;  %v1299_v40 = vld [vmem:[#allocation2 + $0x1f8] sm:$0xf0]  ;;  %v1238_v47 = vor.u32 %v1557_v35, %v1235_v38  ;;  %v1539_v49 = vld [vmem:[#allocation2 + $0xe4] sm:$0xf]  ;;  %v1102_v55 = vor.u32 %v1523_v45, %v1099_v46 }
  0x28   :  { %528 = vmatpush.bf16.msra.mxu2 %v1194_v10  ;;  %v1302_v48 = vor.u32 %v1573_v39, %v1299_v40  ;;  %v1163_v50 = vld [vmem:[#allocation2 + $0xe8] sm:$0xf0]  ;;  %v1555_v51 = vld [vmem:[#allocation2 + $0x164] sm:$0xf]  ;;  %v1521_v59 = vld [vmem:[#allocation2 + $0x54] sm:$0xf] }
  0x29   :  { %542 = vmatpush.bf16.msra.mxu3 %v1258_v14  ;;  %v1227_v52 = vld [vmem:[#allocation2 + $0x168] sm:$0xf0]  ;;  %v1571_v53 = vld [vmem:[#allocation2 + $0x1e4] sm:$0xf]  ;;  %v1166_v56 = vor.u32 %v1539_v49, %v1163_v50  ;;  %v1091_v60 = vld [vmem:[#allocation2 + $0x58] sm:$0xf0] }
  0x2a   :  { %501 = vmatpush.bf16.msra.mxu0 %v1058_v21  ;;  %v1291_v54 = vld [vmem:[#allocation2 + $0x1e8] sm:$0xf0]  ;;  %v1230_v57 = vor.u32 %v1555_v51, %v1227_v52  ;;  %v1537_v61 = vld [vmem:[#allocation2 + $0xd4] sm:$0xf]  ;;  %v1094_v62 = vor.u32 %v1521_v59, %v1091_v60  ;;  %v1155_v63 = vld [vmem:[#allocation2 + $0xd8] sm:$0xf0] }
  0x2b   :  { %515 = vmatpush.bf16.msra.mxu1 %v1122_v22  ;;  %v1294_v58 = vor.u32 %v1571_v53, %v1291_v54  ;;  %v1553_v0 = vld [vmem:[#allocation2 + $0x154] sm:$0xf]  ;;  %v1219_v1 = vld [vmem:[#allocation2 + $0x158] sm:$0xf0]  ;;  %v1158_v2 = vor.u32 %v1537_v61, %v1155_v63  ;;  %v1519_v6 = vld [vmem:[#allocation2 + $0x44] sm:$0xf] }
  0x2c   :  { %529 = vmatpush.bf16.msra.mxu2 %v1186_v26  ;;  %v1222_v3 = vor.u32 %v1553_v0, %v1219_v1  ;;  %v1569_v4 = vld [vmem:[#allocation2 + $0x1d4] sm:$0xf]  ;;  %v1283_v5 = vld [vmem:[#allocation2 + $0x1d8] sm:$0xf0]  ;;  %v1083_v8 = vld [vmem:[#allocation2 + $0x48] sm:$0xf0] }
  0x2d   :  { %543 = vmatpush.bf16.msra.mxu3 %v1250_v30  ;;  %v1286_v7 = vor.u32 %v1569_v4, %v1283_v5  ;;  %v1535_v9 = vld [vmem:[#allocation2 + $0xc4] sm:$0xf]  ;;  %v1147_v10 = vld [vmem:[#allocation2 + $0xc8] sm:$0xf0]  ;;  %v1086_v11 = vor.u32 %v1519_v6, %v1083_v8  ;;  %v1517_v19 = vld [vmem:[#allocation2 + $0x34] sm:$0xf] }
  0x2e   :  { %502 = vmatpush.bf16.msra.mxu0 %v1050_v36  ;;  %v1150_v12 = vor.u32 %v1535_v9, %v1147_v10  ;;  %v1551_v13 = vld [vmem:[#allocation2 + $0x144] sm:$0xf]  ;;  %v1211_v14 = vld [vmem:[#allocation2 + $0x148] sm:$0xf0]  ;;  %v1075_v20 = vld [vmem:[#allocation2 + $0x38] sm:$0xf0] }
  0x2f   :  { %516 = vmatpush.bf16.msra.mxu1 %v1114_v37  ;;  %v1567_v15 = vld [vmem:[#allocation2 + $0x1c4] sm:$0xf]  ;;  %v1214_v16 = vor.u32 %v1551_v13, %v1211_v14  ;;  %v1275_v17 = vld [vmem:[#allocation2 + $0x1c8] sm:$0xf0]  ;;  %v1533_v21 = vld [vmem:[#allocation2 + $0xb4] sm:$0xf]  ;;  %v1078_v22 = vor.u32 %v1517_v19, %v1075_v20 }
  0x30   :  { %530 = vmatpush.bf16.msra.mxu2 %v1178_v41  ;;  %v1278_v18 = vor.u32 %v1567_v15, %v1275_v17  ;;  %v1139_v23 = vld [vmem:[#allocation2 + $0xb8] sm:$0xf0]  ;;  %v1549_v24 = vld [vmem:[#allocation2 + $0x134] sm:$0xf]  ;;  %v1515_v30 = vld [vmem:[#allocation2 + $0x24] sm:$0xf] }
  0x31   :  { %544 = vmatpush.bf16.msra.mxu3 %v1242_v43  ;;  %v1203_v25 = vld [vmem:[#allocation2 + $0x138] sm:$0xf0]  ;;  %v1142_v26 = vor.u32 %v1533_v21, %v1139_v23  ;;  %v1565_v28 = vld [vmem:[#allocation2 + $0x1b4] sm:$0xf]  ;;  %v1067_v32 = vld [vmem:[#allocation2 + $0x28] sm:$0xf0] }
  0x32   :  { %551 = vmatpush.bf16.msrb.mxu0 %v1110_v42  ;;  %v1206_v27 = vor.u32 %v1549_v24, %v1203_v25  ;;  %v1267_v29 = vld [vmem:[#allocation2 + $0x1b8] sm:$0xf0]  ;;  %v1531_v33 = vld [vmem:[#allocation2 + $0xa4] sm:$0xf]  ;;  %v1131_v34 = vld [vmem:[#allocation2 + $0xa8] sm:$0xf0]  ;;  %v1070_v35 = vor.u32 %v1515_v30, %v1067_v32 }
  0x33   :  { %565 = vmatpush.bf16.msrb.mxu1 %v1174_v44  ;;  %v1270_v31 = vor.u32 %v1565_v28, %v1267_v29  ;;  %v1134_v36 = vor.u32 %v1531_v33, %v1131_v34  ;;  %v1547_v37 = vld [vmem:[#allocation2 + $0x124] sm:$0xf]  ;;  %v1195_v38 = vld [vmem:[#allocation2 + $0x128] sm:$0xf0]  ;;  %v1513_v42 = vld [vmem:[#allocation2 + $0x14] sm:$0xf] }
  0x34   :  { %579 = vmatpush.bf16.msrb.mxu2 %v1238_v47  ;;  %v1563_v39 = vld [vmem:[#allocation2 + $0x1a4] sm:$0xf]  ;;  %v1198_v40 = vor.u32 %v1547_v37, %v1195_v38  ;;  %v1259_v41 = vld [vmem:[#allocation2 + $0x1a8] sm:$0xf0]  ;;  %v1059_v43 = vld [vmem:[#allocation2 + $0x18] sm:$0xf0] }
  0x35   :  { %593 = vmatpush.bf16.msrb.mxu3 %v1302_v48  ;;  %v1262_v44 = vor.u32 %v1563_v39, %v1259_v41  ;;  %v1529_v45 = vld [vmem:[#allocation2 + $0x94] sm:$0xf]  ;;  %v1123_v46 = vld [vmem:[#allocation2 + $0x98] sm:$0xf0]  ;;  %v1062_v48 = vor.u32 %v1513_v42, %v1059_v43  ;;  %v1511_v54 = vld [vmem:[#allocation2 + $0x4] sm:$0xf] }
  0x36   :  { %552 = vmatpush.bf16.msrb.mxu0 %v1102_v55  ;;  %v1545_v47 = vld [vmem:[#allocation2 + $0x114] sm:$0xf]  ;;  %v1187_v49 = vld [vmem:[#allocation2 + $0x118] sm:$0xf0]  ;;  %v1126_v52 = vor.u32 %v1529_v45, %v1123_v46  ;;  %v1051_v55 = vld [vmem:[#allocation2 + $0x8] sm:$0xf0] }
  0x37   :  { %566 = vmatpush.bf16.msrb.mxu1 %v1166_v56  ;;  %v1561_v50 = vld [vmem:[#allocation2 + $0x194] sm:$0xf]  ;;  %v1251_v51 = vld [vmem:[#allocation2 + $0x198] sm:$0xf0]  ;;  %v1190_v53 = vor.u32 %v1545_v47, %v1187_v49  ;;  %v1527_v56 = vld [vmem:[#allocation2 + $0x84] sm:$0xf]  ;;  %v1054_v63 = vor.u32 %v1511_v54, %v1051_v55 }
  0x38   :  { %580 = vmatpush.bf16.msrb.mxu2 %v1230_v57  ;;  %v1254_v57 = vor.u32 %v1561_v50, %v1251_v51  ;;  %v1543_v59 = vld [vmem:[#allocation2 + $0x104] sm:$0xf]  ;;  %v1179_v60 = vld [vmem:[#allocation2 + $0x108] sm:$0xf0]  ;;  %v1377_v6 = vld [vmem:[#allocation4 + $0x70] sm:$0xf] }
  0x39   :  { %594 = vmatpush.bf16.msrb.mxu3 %v1294_v58  ;;  %v1115_v58 = vld [vmem:[#allocation2 + $0x88] sm:$0xf0]  ;;  %v1559_v61 = vld [vmem:[#allocation2 + $0x184] sm:$0xf]  ;;  %v1182_v1 = vor.u32 %v1543_v59, %v1179_v60  ;;  %v1589_v10 = vld [vmem:[#allocation4 + $0x74] sm:$0xf] }
  0x3a   :  { %553 = vmatpush.bf16.msrb.mxu0 %v1094_v62  ;;  %v1243_v62 = vld [vmem:[#allocation2 + $0x188] sm:$0xf0]  ;;  %v1118_v0 = vor.u32 %v1527_v56, %v1115_v58  ;;  %v1369_v15 = vld [vmem:[#allocation4 + $0x60] sm:$0xf]  ;;  %v1718_v19 = vmov 1.0|1.0  }
  0x3b   :  { %567 = vmatpush.bf16.msrb.mxu1 %v1158_v2  ;;  %v1246_v2 = vor.u32 %v1559_v61, %v1243_v62  ;;  %v1587_v21 = vld [vmem:[#allocation4 + $0x64] sm:$0xf]  ;;  %v1585_v29 = vld [vmem:[#allocation4 + $0x54] sm:$0xf]  ;;  %v1363_v30 = vld [vmem:[#allocation4 + $0x58] sm:$0xf0] }
  0x3c   :  { %581 = vmatpush.bf16.msrb.mxu2 %v1222_v3  ;;  %v72_v3 = vlaneseq  ;;  %v1366_v32 = vor.u32 %v1585_v29, %v1363_v30  ;;  %v1353_v33 = vld [vmem:[#allocation4 + $0x40] sm:$0xf]  ;;  %v1584_v34 = vld [vmem:[#allocation4 + $0x44] sm:$0xf0]  ;;  %v1355_v37 = vld [vmem:[#allocation4 + $0x48] sm:$0xf0] }
  0x3d   :  { %595 = vmatpush.bf16.msrb.mxu3 %v1286_v7  ;;  %v1590_v7 = vld [vmem:[#allocation4 + $0x74] sm:$0xf0]  ;;  %v1345_v39 = vld [vmem:[#allocation4 + $0x30] sm:$0xf]  ;;  %v1347_v45 = vld [vmem:[#allocation4 + $0x38] sm:$0xf0] }
  0x3e   :  { %554 = vmatpush.bf16.msrb.mxu0 %v1086_v11  ;;  %v73_v5 = vand.u32 127, %v72_v3  ;;  %v1379_v11 = vld [vmem:[#allocation4 + $0x78] sm:$0xf0]  ;;  %v1378_v14 = vor.u32 %v1590_v7, %v1377_v6  ;;  %v1441_v41 = vld [vmem:[#allocation4 + $0xf0] sm:$0xf] }
  0x3f   :  { %568 = vmatpush.bf16.msrb.mxu1 %v1150_v12  ;;  %v1606_v43 = vld [vmem:[#allocation4 + $0xf4] sm:$0xf0]  ;;  %v1443_v49 = vld [vmem:[#allocation4 + $0xf8] sm:$0xf0]  ;;  %v1337_v51 = vld [vmem:[#allocation4 + $0x20] sm:$0xf] }
  0x40   :  { %582 = vmatpush.bf16.msrb.mxu2 %v1214_v16  ;;  %v74_v8 = vadd.s32 128, %v73_v5  ;;  %v75_v9 = vadd.s32 256, %v73_v5  ;;  %v76_v13 = vadd.s32 384, %v73_v5  ;;  %v1588_v16 = vld [vmem:[#allocation4 + $0x64] sm:$0xf0]  ;;  %v1442_v46 = vor.u32 %v1606_v43, %v1441_v41 }
  0x41   :  { %596 = vmatpush.bf16.msrb.mxu3 %v1278_v18  ;;  %v1382_v18 = vor.u32 %v1589_v10, %v1379_v11  ;;  %v1370_v24 = vor.u32 %v1588_v16, %v1369_v15  ;;  %v1604_v55 = vld [vmem:[#allocation4 + $0xe4] sm:$0xf0]  ;;  %v1579_v56 = vld [vmem:[#allocation4 + $0x24] sm:$0xf]  ;;  %v1435_v61 = vld [vmem:[#allocation4 + $0xe8] sm:$0xf0] }
  0x42   :  { %555 = vmatpush.bf16.msrb.mxu0 %v1078_v22  ;;  %v1371_v22 = vld [vmem:[#allocation4 + $0x68] sm:$0xf0]  ;;  %v1603_v60 = vld [vmem:[#allocation4 + $0xe4] sm:$0xf]  ;;  %v1602_v3 = vld [vmem:[#allocation4 + $0xd4] sm:$0xf0] }
  0x43   :  { %569 = vmatpush.bf16.msrb.mxu1 %v1142_v26  ;;  %v1361_v26 = vld [vmem:[#allocation4 + $0x50] sm:$0xf]  ;;  %v1374_v28 = vor.u32 %v1587_v21, %v1371_v22  ;;  %v1438_v62 = vor.u32 %v1603_v60, %v1435_v61  ;;  %v1321_v11 = vld [vmem:[#allocation4] sm:$0xf]  ;;  %v1600_v15 = vld [vmem:[#allocation4 + $0xc4] sm:$0xf0] }
  0x44   :  { %583 = vmatpush.bf16.msrb.mxu2 %v1206_v27  ;;  %v1586_v27 = vld [vmem:[#allocation4 + $0x54] sm:$0xf0]  ;;  %v1575_v16 = vld [vmem:[#allocation4 + $0x4] sm:$0xf]  ;;  %v1323_v17 = vld [vmem:[#allocation4 + $0x8] sm:$0xf0] }
  0x45   :  { %597 = vmatpush.bf16.msrb.mxu3 %v1270_v31  ;;  %v1362_v31 = vor.u32 %v1586_v27, %v1361_v26  ;;  %v1599_v20 = vld [vmem:[#allocation4 + $0xc4] sm:$0xf]  ;;  %v1419_v21 = vld [vmem:[#allocation4 + $0xc8] sm:$0xf0]  ;;  %v1409_v23 = vld [vmem:[#allocation4 + $0xb0] sm:$0xf] }
  0x46   :  { %556 = vmatpush.bf16.msrb.mxu0 %v1070_v35  ;;  %v1583_v35 = vld [vmem:[#allocation4 + $0x44] sm:$0xf]  ;;  %v1422_v22 = vor.u32 %v1599_v20, %v1419_v21  ;;  %v1597_v25 = vld [vmem:[#allocation4 + $0xb4] sm:$0xf]  ;;  %v1411_v27 = vld [vmem:[#allocation4 + $0xb8] sm:$0xf0] }
  0x47   :  { %570 = vmatpush.bf16.msrb.mxu1 %v1134_v36  ;;  %v1354_v36 = vor.u32 %v1584_v34, %v1353_v33  ;;  %v1358_v38 = vor.u32 %v1583_v35, %v1355_v37  ;;  %v1401_v29 = vld [vmem:[#allocation4 + $0xa0] sm:$0xf]  ;;  %v1596_v30 = vld [vmem:[#allocation4 + $0xa4] sm:$0xf0]  ;;  %v1403_v33 = vld [vmem:[#allocation4 + $0xa8] sm:$0xf0] }
  0x48   :  { %584 = vmatpush.bf16.msrb.mxu2 %v1198_v40  ;;  %v1582_v40 = vld [vmem:[#allocation4 + $0x34] sm:$0xf0]  ;;  %v1393_v35 = vld [vmem:[#allocation4 + $0x90] sm:$0xf]  ;;  %v1593_v37 = vld [vmem:[#allocation4 + $0x94] sm:$0xf] }
  0x49   :  { %598 = vmatpush.bf16.msrb.mxu3 %v1262_v44  ;;  %v1346_v42 = vor.u32 %v1582_v40, %v1345_v39  ;;  %v1581_v44 = vld [vmem:[#allocation4 + $0x34] sm:$0xf]  ;;  %v1395_v39 = vld [vmem:[#allocation4 + $0x98] sm:$0xf0]  ;;  %v1385_v43 = vld [vmem:[#allocation4 + $0x80] sm:$0xf] }
  0x4a   :  { %557 = vmatpush.bf16.msrb.mxu0 %v1062_v48  ;;  %v1350_v47 = vor.u32 %v1581_v44, %v1347_v45  ;;  %v1605_v48 = vld [vmem:[#allocation4 + $0xf4] sm:$0xf]  ;;  %v1398_v41 = vor.u32 %v1593_v37, %v1395_v39  ;;  %v1592_v44 = vld [vmem:[#allocation4 + $0x84] sm:$0xf0]  ;;  %v1591_v45 = vld [vmem:[#allocation4 + $0x84] sm:$0xf] }
  0x4b   :  { %571 = vmatpush.bf16.msrb.mxu1 %v1126_v52  ;;  %v1446_v50 = vor.u32 %v1605_v48, %v1443_v49  ;;  %v1580_v52 = vld [vmem:[#allocation4 + $0x24] sm:$0xf0]  ;;  %v1610_v20 = vld [vmem:[#allocation6 + $0x18] sm:$0xff]  ;;  %v1619_v21 = vld [vmem:[#allocation6 + $0x60] sm:$0xff] }
  0x4c   :  { %585 = vmatpush.bf16.msrb.mxu2 %v1190_v53  ;;  %v1433_v53 = vld [vmem:[#allocation4 + $0xe0] sm:$0xf]  ;;  %v1338_v54 = vor.u32 %v1580_v52, %v1337_v51 }
  0x4d   :  { %599 = vmatpush.bf16.msrb.mxu3 %v1254_v57  ;;  %v1339_v57 = vld [vmem:[#allocation4 + $0x28] sm:$0xf0]  ;;  %v1434_v58 = vor.u32 %v1604_v55, %v1433_v53 }
  0x4e   :  { %558 = vmatpush.bf16.msrb.mxu0 %v1054_v63  ;;  %v1342_v59 = vor.u32 %v1579_v56, %v1339_v57  ;;  %v1329_v63 = vld [vmem:[#allocation4 + $0x10] sm:$0xf] }
  0x4f   :  { %572 = vmatpush.bf16.msrb.mxu1 %v1118_v0  ;;  %v1578_v0 = vld [vmem:[#allocation4 + $0x14] sm:$0xf0] }
  0x50   :  { %586 = vmatpush.bf16.msrb.mxu2 %v1182_v1  ;;  %v1425_v1 = vld [vmem:[#allocation4 + $0xd0] sm:$0xf] }
  0x51   :  { %600 = vmatpush.bf16.msrb.mxu3 %v1246_v2  ;;  %v1330_v2 = vor.u32 %v1578_v0, %v1329_v63  ;;  %v1426_v6 = vor.u32 %v1602_v3, %v1425_v1 }
  0x82   :  { %v79_v4 = vpop.permute.xlu0 %78 }
  0x83   :  { %vm83_vm0 = vcmp.eq.s32.totalorder %v79_v4, %v73_v5  ;;  %vm84_vm5 = vcmp.eq.s32.totalorder %v79_v4, %v74_v8  ;;  %vm85_vm8 = vcmp.eq.s32.totalorder %v79_v4, %v75_v9  ;;  %vm86_vm10 = vcmp.eq.s32.totalorder %v79_v4, %v76_v13  ;;  %v1577_v4 = vld [vmem:[#allocation4 + $0x14] sm:$0xf] }
  0x8a   :  { %v82_v12 = vpop.permute.xlu0 %81 }
  0x8b   :  { %vm87_vm1 = vcmp.eq.s32.totalorder %v82_v12, %v73_v5  ;;  %vm88_vm2 = vcmp.eq.s32.totalorder %v82_v12, %v74_v8  ;;  %vm89_vm3 = vcmp.eq.s32.totalorder %v82_v12, %v75_v9  ;;  %vm90_vm6 = vcmp.eq.s32.totalorder %v82_v12, %v76_v13  ;;  %v1331_v5 = vld [vmem:[#allocation4 + $0x18] sm:$0xf0]  ;;  %v1601_v8 = vld [vmem:[#allocation4 + $0xd4] sm:$0xf]  ;;  %v1576_v12 = vld [vmem:[#allocation4 + $0x4] sm:$0xf0] }
  0x8c   :  { %vm1769_vm4 = vmpackc.low %vm87_vm1, %vm83_vm0  ;;  %v1334_v7 = vor.u32 %v1577_v4, %v1331_v5  ;;  %v1427_v9 = vld [vmem:[#allocation4 + $0xd8] sm:$0xf0]  ;;  %v1417_v13 = vld [vmem:[#allocation4 + $0xc0] sm:$0xf] }
  0x8d   :  { %1304 = vmatmul.msk.bf16.vlgmr.msra.gmra.mxu0 %vm1769_vm4, %v1718_v19  ;;  %vm1775_vm7 = vmpackc.low %vm88_vm2, %vm84_vm5  ;;  %v1430_v10 = vor.u32 %v1601_v8, %v1427_v9 }
  0x8e   :  { %1306 = vmatmul.msk.bf16.vlgmr.msra.gmra.mxu1 %vm1775_vm7, %v1718_v19  ;;  %vm1781_vm9 = vmpackc.low %vm89_vm3, %vm85_vm8  ;;  %807 = vmatpush.bf16.msra.mxu0 %v1378_v14  ;;  %v1322_v14 = vor.u32 %v1576_v12, %v1321_v11 }
  0x8f   :  { %1308 = vmatmul.msk.bf16.vlgmr.msra.gmra.mxu2 %vm1781_vm9, %v1718_v19  ;;  %vm1787_vm11 = vmpackc.low %vm90_vm6, %vm86_vm10  ;;  %821 = vmatpush.bf16.msra.mxu1 %v1442_v46  ;;  %v1386_v46 = vor.u32 %v1592_v44, %v1385_v43 }
  0x90   :  { %1310 = vmatmul.msk.bf16.vlgmr.msra.gmra.mxu3 %vm1787_vm11, %v1718_v19  ;;  %835 = vmatpush.bf16.msra.mxu2 %v1382_v18  ;;  %v1418_v18 = vor.u32 %v1600_v15, %v1417_v13  ;;  %v1614_v13 = vld [vmem:[#allocation6 + $0x38] sm:$0xff] }
  0x91   :  { %849 = vmatpush.bf16.msra.mxu3 %v1446_v50  ;;  %v1622_v15 = vld [vmem:[#allocation6 + $0x78] sm:$0xff] }
  0x92   :  { %808 = vmatpush.bf16.msra.mxu0 %v1370_v24  ;;  %v1598_v24 = vld [vmem:[#allocation4 + $0xb4] sm:$0xf0] }
  0x93   :  { %822 = vmatpush.bf16.msra.mxu1 %v1434_v58  ;;  %v1410_v26 = vor.u32 %v1598_v24, %v1409_v23  ;;  %v1618_v23 = vld [vmem:[#allocation6 + $0x58] sm:$0xff]  ;;  %v1608_v24 = vld [vmem:[#allocation6 + $0x8] sm:$0xff] }
  0x94   :  { %836 = vmatpush.bf16.msra.mxu2 %v1374_v28  ;;  %v1414_v28 = vor.u32 %v1597_v25, %v1411_v27  ;;  %v1617_v25 = vld [vmem:[#allocation6 + $0x50] sm:$0xff]  ;;  %v1616_v27 = vld [vmem:[#allocation6 + $0x48] sm:$0xff] }
  0x95   :  { %850 = vmatpush.bf16.msra.mxu3 %v1438_v62 }
  0x96   :  { %809 = vmatpush.bf16.msra.mxu0 %v1362_v31  ;;  %v1595_v31 = vld [vmem:[#allocation4 + $0xa4] sm:$0xf] }
  0x97   :  { %823 = vmatpush.bf16.msra.mxu1 %v1426_v6  ;;  %v1406_v34 = vor.u32 %v1595_v31, %v1403_v33 }
  0x98   :  { %837 = vmatpush.bf16.msra.mxu2 %v1366_v32  ;;  %v1402_v32 = vor.u32 %v1596_v30, %v1401_v29  ;;  %v641_v30 = vld [vmem:[%s1816_s3] sm:$0x3] }
  0x99   :  { %851 = vmatpush.bf16.msra.mxu3 %v1430_v10  ;;  %v643_v33 = vperm.slane %v641_v30, 0  ;;  %v644_v37 = vperm.slane %v641_v30, 1 }
  0x9a   :  { %810 = vmatpush.bf16.msra.mxu0 %v1354_v36  ;;  %v1594_v36 = vld [vmem:[#allocation4 + $0x94] sm:$0xf0] }
  0x9b   :  { %824 = vmatpush.bf16.msra.mxu1 %v1418_v18  ;;  %v1611_v18 = vld [vmem:[#allocation6 + $0x20] sm:$0xff] }
  0x9c   :  { %838 = vmatpush.bf16.msra.mxu2 %v1358_v38  ;;  %v1394_v38 = vor.u32 %v1594_v36, %v1393_v35 }
  0x9d   :  { %1312 = vmatmul.msk.bf16.vlgmr.msrb.gmra.mxu0 %vm1769_vm4, %v1718_v19  ;;  %852 = vmatpush.bf16.msra.mxu3 %v1422_v22  ;;  %v1609_v22 = vld [vmem:[#allocation6 + $0x10] sm:$0xff] }
  0x9e   :  { %1314 = vmatmul.msk.bf16.vlgmr.msrb.gmra.mxu1 %vm1775_vm7, %v1718_v19  ;;  %811 = vmatpush.bf16.msra.mxu0 %v1346_v42 }
  0x9f   :  { %1316 = vmatmul.msk.bf16.vlgmr.msrb.gmra.mxu2 %vm1781_vm9, %v1718_v19  ;;  %825 = vmatpush.bf16.msra.mxu1 %v1410_v26  ;;  %v1607_v26 = vld [vmem:[#allocation6] sm:$0xff] }
  0xa0   :  { %1318 = vmatmul.msk.bf16.vlgmr.msrb.gmra.mxu3 %vm1787_vm11, %v1718_v19  ;;  %839 = vmatpush.bf16.msra.mxu2 %v1350_v47  ;;  %v1326_v19 = vor.u32 %v1575_v16, %v1323_v17  ;;  %v1387_v47 = vld [vmem:[#allocation4 + $0x88] sm:$0xf0]  ;;  %v1621_v17 = vld [vmem:[#allocation6 + $0x70] sm:$0xff] }
  0xa1   :  { %853 = vmatpush.bf16.msra.mxu3 %v1414_v28  ;;  %v1390_v48 = vor.u32 %v1591_v45, %v1387_v47  ;;  %v1612_v16 = vld [vmem:[#allocation6 + $0x28] sm:$0xff]  ;;  %v1615_v28 = vld [vmem:[#allocation6 + $0x40] sm:$0xff] }
  0xa2   :  { %812 = vmatpush.bf16.msra.mxu0 %v1338_v54 }
  0xa3   :  { %826 = vmatpush.bf16.msra.mxu1 %v1402_v32 }
  0xa4   :  { %840 = vmatpush.bf16.msra.mxu2 %v1342_v59 }
  0xa5   :  { %854 = vmatpush.bf16.msra.mxu3 %v1406_v34 }
  0xa6   :  { %813 = vmatpush.bf16.msra.mxu0 %v1330_v2 }
  0xa7   :  { %827 = vmatpush.bf16.msra.mxu1 %v1394_v38 }
  0xa8   :  { %841 = vmatpush.bf16.msra.mxu2 %v1334_v7 }
  0xa9   :  { %855 = vmatpush.bf16.msra.mxu3 %v1398_v41 }
  0xaa   :  { %814 = vmatpush.bf16.msra.mxu0 %v1322_v14  ;;  %v1613_v14 = vld [vmem:[#allocation6 + $0x30] sm:$0xff] }
  0xab   :  { %828 = vmatpush.bf16.msra.mxu1 %v1386_v46 }
  0xac   :  { %842 = vmatpush.bf16.msra.mxu2 %v1326_v19  ;;  %v1620_v19 = vld [vmem:[#allocation6 + $0x68] sm:$0xff] }
  0xad   :  { %856 = vmatpush.bf16.msra.mxu3 %v1390_v48 }
  0xae   :  { %1001 = vmatpush.bf16.msrb.mxu0 %v1614_v13 }
  0xaf   :  { %1015 = vmatpush.bf16.msrb.mxu1 %v1622_v15 }
  0xb2   :  { %1002 = vmatpush.bf16.msrb.mxu0 %v1613_v14 }
  0xb3   :  { %1016 = vmatpush.bf16.msrb.mxu1 %v1621_v17 }
  0xb6   :  { %1003 = vmatpush.bf16.msrb.mxu0 %v1612_v16 }
  0xb7   :  { %1017 = vmatpush.bf16.msrb.mxu1 %v1620_v19 }
  0xba   :  { %1004 = vmatpush.bf16.msrb.mxu0 %v1611_v18 }
  0xbb   :  { %1018 = vmatpush.bf16.msrb.mxu1 %v1619_v21 }
  0xbe   :  { %1005 = vmatpush.bf16.msrb.mxu0 %v1610_v20 }
  0xbf   :  { %1019 = vmatpush.bf16.msrb.mxu1 %v1618_v23 }
  0xc2   :  { %1006 = vmatpush.bf16.msrb.mxu0 %v1609_v22 }
  0xc3   :  { %1020 = vmatpush.bf16.msrb.mxu1 %v1617_v25 }
  0xc6   :  { %1007 = vmatpush.bf16.msrb.mxu0 %v1608_v24 }
  0xc7   :  { %1021 = vmatpush.bf16.msrb.mxu1 %v1616_v27 }
  0xca   :  { %1008 = vmatpush.bf16.msrb.mxu0 %v1607_v26 }
  0xcb   :  { %1022 = vmatpush.bf16.msrb.mxu1 %v1615_v28 }
 0x10a   :  { %v504_v40 = vpop.f32.mrf.mxu0 }
 0x10b   :  { %v518_v42 = vpop.f32.mrf.mxu1 }
 0x10c   :  { %v519_v53 = vadd.f32 %v518_v42, %v504_v40 }
 0x112   :  { %v532_v49 = vpop.f32.mrf.mxu2  ;;  %v506_v50 = vpop.f32.mrf.mxu0 }
 0x113   :  { %v546_v51 = vpop.f32.mrf.mxu3  ;;  %v520_v52 = vpop.f32.mrf.mxu1  ;;  %v533_v54 = vadd.f32 %v532_v49, %v519_v53 }
 0x114   :  { %v521_v55 = vadd.f32 %v520_v52, %v506_v50 }
 0x115   :  { %v547_v61 = vadd.f32 %v546_v51, %v533_v54 }
 0x11a   :  { %v534_v56 = vpop.f32.mrf.mxu2  ;;  %v560_v59 = vpop.f32.mrf.mxu0 }
 0x11b   :  { %v535_v57 = vadd.f32 %v534_v56, %v521_v55  ;;  %v548_v58 = vpop.f32.mrf.mxu3  ;;  %v574_v60 = vpop.f32.mrf.mxu1  ;;  %v1633_v55 = vld [vmem:[%s1818_s5] ss:$0 sm:$0xff] }
 0x11c   :  { %v575_v4 = vadd.f32 %v574_v60, %v560_v59 }
 0x11d   :  { %v549_v62 = vadd.f32 %v548_v58, %v535_v57 }
 0x11f   :  { %v607_v63 = vpack.c.bf16 %v549_v62, %v547_v61 }
 0x121   :  { %815 = vmatmul.bf16.vlgmr.msra.gmra.mxu0 %v607_v63  ;;  %843 = vmatmul.bf16.vlgmr.msra.gmra.mxu2 %v607_v63 }
 0x122   :  { %v588_v0 = vpop.f32.mrf.mxu2  ;;  %v562_v2 = vpop.f32.mrf.mxu0 }
 0x123   :  { %v602_v1 = vpop.f32.mrf.mxu3  ;;  %v576_v3 = vpop.f32.mrf.mxu1  ;;  %v589_v5 = vadd.f32 %v588_v0, %v575_v4 }
 0x124   :  { %v577_v6 = vadd.f32 %v576_v3, %v562_v2 }
 0x125   :  { %v603_v10 = vadd.f32 %v602_v1, %v589_v5 }
 0x12a   :  { %v590_v7 = vpop.f32.mrf.mxu2 }
 0x12b   :  { %v591_v8 = vadd.f32 %v590_v7, %v577_v6  ;;  %v604_v9 = vpop.f32.mrf.mxu3 }
 0x12d   :  { %v605_v11 = vadd.f32 %v604_v9, %v591_v8 }
 0x12f   :  { %v608_v12 = vpack.c.bf16 %v605_v11, %v603_v10 }
 0x131   :  { %829 = vmatmul.bf16.vlgmr.msra.gmra.mxu1 %v608_v12  ;;  %857 = vmatmul.bf16.vlgmr.msra.gmra.mxu3 %v608_v12 }
 0x19e   :  { %v816_v29 = vpop.f32.mrf.mxu0 }
 0x19f   :  { %v817_v35 = vadd.f32 %v816_v29, %v643_v33 }
 0x1a4   :  { %v844_v31 = vpop.f32.mrf.mxu2 }
 0x1a5   :  { %v845_v43 = vadd.f32 %v844_v31, %v644_v37 }
 0x1a6   :  { %v818_v34 = vpop.f32.mrf.mxu0 }
 0x1a7   :  { %v819_v38 = vadd.f32 %v818_v34, %v643_v33 }
 0x1ac   :  { %v846_v42 = vpop.f32.mrf.mxu2 }
 0x1ad   :  { %v847_v46 = vadd.f32 %v846_v42, %v644_v37 }
 0x1ae   :  { %v830_v32 = vpop.f32.mrf.mxu1 }
 0x1af   :  { %v831_v39 = vadd.f32 %v830_v32, %v817_v35 }
 0x1b1   :  { %v863_v44 = vmax.f32 %v831_v39, 0.0 }
 0x1b4   :  { %v858_v36 = vpop.f32.mrf.mxu3 }
 0x1b5   :  { %v859_v47 = vadd.f32 %v858_v36, %v845_v43 }
 0x1b6   :  { %v832_v40 = vpop.f32.mrf.mxu1 }
 0x1b7   :  { %v833_v41 = vadd.f32 %v832_v40, %v819_v38  ;;  %v864_v51 = vmax.f32 %v859_v47, 0.0 }
 0x1b9   :  { %v865_v45 = vmax.f32 %v833_v41, 0.0 }
 0x1bb   :  { %v867_v48 = vpack.c.bf16 %v865_v45, %v863_v44 }
 0x1bc   :  { %v860_v49 = vpop.f32.mrf.mxu3 }
 0x1bd   :  { %v861_v50 = vadd.f32 %v860_v49, %v847_v46  ;;  %1009 = vmatmul.bf16.vlgmr.msrb.gmra.mxu0 %v867_v48 }
 0x1bf   :  { %v866_v52 = vmax.f32 %v861_v50, 0.0 }
 0x1c1   :  { %v868_v53 = vpack.c.bf16 %v866_v52, %v864_v51 }
 0x1c3   :  { %1023 = vmatmul.bf16.vlgmr.msrb.gmra.mxu1 %v868_v53 }
 0x23a   :  { %v1010_v54 = vpop.f32.mrf.mxu0 }
 0x23b   :  { %v1011_v56 = vadd.f32 %v1633_v55, %v1010_v54 }
 0x240   :  { %v1024_v57 = vpop.f32.mrf.mxu1 }
 0x241   :  { %v1025_v58 = vadd.f32 %v1024_v57, %v1011_v56 }
 0x242   :  { %v1012_v60 = vpop.f32.mrf.mxu0 }
 0x243   :  { %v1029_v59 = vmax.f32 %v1025_v58, 0.0  ;;  %v1013_v61 = vadd.f32 %v1633_v55, %v1012_v60 }
 0x245   :  { %1031 = vst [vmem:[%s1819_s6] sm:$0xff] %v1029_v59 }
 0x248   :  { %v1026_v62 = vpop.f32.mrf.mxu1 }
 0x249   :  { %v1027_v63 = vadd.f32 %v1026_v62, %v1013_v61 }
 0x24b   :  { %v1030_v0 = vmax.f32 %v1027_v63, 0.0 }
 0x24d   :  { %1032 = vst [vmem:[%s1819_s6 + $0x8] sm:$0xff] %v1030_v0 }
 0x24e   :  { %1037 = vsyncpa [#allocation3], 1 }
 0x24f   :  { %1038 = vsyncpa [#allocation5], 1 }

</bundles_post_ra>
